<compile_context>
chip_gen: v6e
topology: v6e:2x2x1
jax: 0.10.0
libtpu: 0.0.40
codegen_flags: <defaults>
</compile_context>

<pallas_src>
import functools

import jax
import jax.numpy as jnp
from jax.experimental import pallas as pl
from jax.experimental.pallas import tpu as pltpu


def _round_up(x, m):
    return ((x + m - 1) // m) * m


def _mlp_kernel(x_ref,
                w1_ref, b1_ref,
                w2_ref, b2_ref,
                w3_ref, b3_ref,
                w4_ref, b4_ref,
                o_ref):
    """Fused 4-layer MLP for one batch tile, entirely in VMEM.

    Weights are bf16 ([in, out] layout) -> fewer MXU passes + half the weight
    DMA on v6e/v7x. All dots accumulate in f32; bias/ReLU are f32 elementwise.
    """
    cdt = w1_ref.dtype  # bf16 compute dtype for the MXU operands
    h = jnp.dot(x_ref[...].astype(cdt), w1_ref[...],
                preferred_element_type=jnp.float32) + b1_ref[...]
    h = jnp.maximum(h, 0.0)
    h = jnp.dot(h.astype(cdt), w2_ref[...],
                preferred_element_type=jnp.float32) + b2_ref[...]
    h = jnp.maximum(h, 0.0)
    h = jnp.dot(h.astype(cdt), w3_ref[...],
                preferred_element_type=jnp.float32) + b3_ref[...]
    h = jnp.maximum(h, 0.0)
    h = jnp.dot(h.astype(cdt), w4_ref[...],
                preferred_element_type=jnp.float32) + b4_ref[...]
    # NOTE: out_features=4 -> masked (non-lane-dense) store. Only fixable by
    # concatenating multiple heads along the feature axis (not applicable here).
    o_ref[...] = h.astype(o_ref.dtype)


# Named index maps (no late-binding-closure hazard).
def _tile_map(i):        # x / output: walk the batch axis
    return (i, 0)


def _resident_map(i):    # weights / biases: same block every step -> stay in VMEM
    return (0, 0)


@functools.partial(jax.jit, static_argnames=("block_b",))
def linear_qn_forward(x, params, *, block_b=512):
    """LinearQN forward pass as one Pallas TPU kernel.

    x:      [B, input_size] float32
    params: dict with w1..w4 (bf16, [in, out] layout) and b1..b4 (f32, [1, out]).
    returns [B, output_size] float32

    For real throughput, batch many states per call (B in the hundreds+): the
    per-call launch overhead dominates at tiny B. For zero-copy, make B a
    multiple of `block_b`; otherwise the batch is padded once here.
    """
    B, in_size = x.shape
    out_size = params["w4"].shape[1]

    # Batch tile: fill the MXU's M dimension (>=256 rows ideal on v6e/v7x) but
    # never exceed the (sublane-rounded) batch for small latency-style calls.
    tb = min(block_b, _round_up(B, 8))
    b_pad = _round_up(B, tb)
    if b_pad != B:
        x = jnp.pad(x, ((0, b_pad - B), (0, 0)))

    operands = (
        x,
        params["w1"], params["b1"],
        params["w2"], params["b2"],
        params["w3"], params["b3"],
        params["w4"], params["b4"],
    )

    in_specs = [pl.BlockSpec((tb, in_size), _tile_map)]
    for op in operands[1:]:
        # Full-array blocks, constant block index -> no re-DMA across the grid.
        in_specs.append(pl.BlockSpec(op.shape, _resident_map))

    out = pl.pallas_call(
        _mlp_kernel,
        grid=(b_pad // tb,),
        in_specs=in_specs,
        out_specs=pl.BlockSpec((tb, out_size), _tile_map),
        out_shape=jax.ShapeDtypeStruct((b_pad, out_size), jnp.float32),
        compiler_params=pltpu.CompilerParams(
            # Batch tiles are independent -> shard across v7x's 2 TensorCores
            # (no-op on single-TC v5e/v6e).
            dimension_semantics=("parallel",)),
    )(*operands)

    # TODO(synk): for strict single-step latency (B tiny, tight loop), add
    # cross-call weight residency (P10-style VMEM+semaphore outputs) instead of
    # re-DMA'ing ~10 KiB of weights every launch.
    return out[:B] if b_pad != B else out


def init_linear_qn_params(key, input_size, output_size, weight_dtype=jnp.bfloat16):
    """nn.Linear-style U(-1/sqrt(fan_in), +1/sqrt(fan_in)) init.

    Weights are stored [in, out] (transposed vs PyTorch's [out, in]) and cast
    once to bf16; biases stay f32.
    """
    dims = [(input_size, 32), (32, 64), (64, 32), (32, output_size)]
    params = {}
    for idx, (fan_in, fan_out) in enumerate(dims, start=1):
        key, kw, kb = jax.random.split(key, 3)
        bound = 1.0 / jnp.sqrt(jnp.asarray(fan_in, jnp.float32))
        w = jax.random.uniform(kw, (fan_in, fan_out), jnp.float32, -bound, bound)
        params[f"w{idx}"] = w.astype(weight_dtype)
        params[f"b{idx}"] = jax.random.uniform(
            kb, (1, fan_out), jnp.float32, -bound, bound)
    return params


def linear_qn_reference(x, params):
    """Plain-JAX reference with the same bf16-weights / f32-accumulation recipe."""
    cdt = params["w1"].dtype
    h = x
    for i in range(1, 5):
        h = jnp.dot(h.astype(cdt), params[f"w{i}"],
                    preferred_element_type=jnp.float32) + params[f"b{i}"]
        if i < 4:
            h = jnp.maximum(h, 0.0)
    return h


if __name__ == "__main__":
    input_size = 16
    output_size = 4

    key = jax.random.PRNGKey(0)
    key, kx_small, kx_big = jax.random.split(key, 3)
    params = init_linear_qn_params(key, input_size, output_size)

    # Small latency-style call (B=2): single 8-row tile, single grid step.
    x_small = jax.random.normal(kx_small, (2, input_size), jnp.float32)
    y_small = jax.block_until_ready(linear_qn_forward(x_small, params))
    assert y_small.shape == (2, output_size)
    y_ref_small = linear_qn_reference(x_small, params)
    assert jnp.allclose(y_small, y_ref_small, atol=2e-3, rtol=2e-3), \
        "small-batch mismatch vs reference"

    # Batched call exercising the 1-D batch grid (600 -> padded to 2x512 tiles).
    x_big = jax.random.normal(kx_big, (600, input_size), jnp.float32)
    y_big = jax.block_until_ready(linear_qn_forward(x_big, params))
    assert y_big.shape == (600, output_size)
    y_ref_big = linear_qn_reference(x_big, params)
    assert jnp.allclose(y_big, y_ref_big, atol=2e-3, rtol=2e-3), \
        "batched mismatch vs reference"

    print("KERNEL_OK")
</pallas_src>

<mosaic_0001>
module attributes {stable_mosaic.version = 11 : i64} {
  func.func @_mlp_kernel(%arg0: i32, %arg1: memref<8x16xf32, #tpu.memory_space<vmem>>, %arg2: memref<16x32xbf16, #tpu.memory_space<vmem>>, %arg3: memref<1x32xf32, #tpu.memory_space<vmem>>, %arg4: memref<32x64xbf16, #tpu.memory_space<vmem>>, %arg5: memref<1x64xf32, #tpu.memory_space<vmem>>, %arg6: memref<64x32xbf16, #tpu.memory_space<vmem>>, %arg7: memref<1x32xf32, #tpu.memory_space<vmem>>, %arg8: memref<32x4xbf16, #tpu.memory_space<vmem>>, %arg9: memref<1x4xf32, #tpu.memory_space<vmem>>, %arg10: memref<8x4xf32, #tpu.memory_space<vmem>>) attributes {dimension_semantics = [#tpu.dimension_semantics<parallel>], iteration_bounds = array<i64: 1>, scalar_prefetch = 0 : i64, scratch_operands = 0 : i64, tpu.core_type = #tpu.core_type<tc>, window_params = [{transform_indices = @transform_0, window_bounds = array<i64: 8, 16>}, {pipeline_mode = #tpu.pipeline_mode<synchronous>, transform_indices = @transform_1, window_bounds = array<i64: 16, 32>}, {pipeline_mode = #tpu.pipeline_mode<synchronous>, transform_indices = @transform_2, window_bounds = array<i64: 1, 32>}, {pipeline_mode = #tpu.pipeline_mode<synchronous>, transform_indices = @transform_3, window_bounds = array<i64: 32, 64>}, {pipeline_mode = #tpu.pipeline_mode<synchronous>, transform_indices = @transform_4, window_bounds = array<i64: 1, 64>}, {pipeline_mode = #tpu.pipeline_mode<synchronous>, transform_indices = @transform_5, window_bounds = array<i64: 64, 32>}, {pipeline_mode = #tpu.pipeline_mode<synchronous>, transform_indices = @transform_6, window_bounds = array<i64: 1, 32>}, {pipeline_mode = #tpu.pipeline_mode<synchronous>, transform_indices = @transform_7, window_bounds = array<i64: 32, 4>}, {pipeline_mode = #tpu.pipeline_mode<synchronous>, transform_indices = @transform_8, window_bounds = array<i64: 1, 4>}, {transform_indices = @transform_9, window_bounds = array<i64: 8, 4>}]} {
    %c0 = arith.constant 0 : index
    %c0_0 = arith.constant 0 : index
    %0 = vector.load %arg1[%c0, %c0_0] : memref<8x16xf32, #tpu.memory_space<vmem>>, vector<8x16xf32>
    %1 = arith.truncf %0 : vector<8x16xf32> to vector<8x16xbf16>
    %c0_1 = arith.constant 0 : index
    %c0_2 = arith.constant 0 : index
    %2 = vector.load %arg2[%c0_1, %c0_2] : memref<16x32xbf16, #tpu.memory_space<vmem>>, vector<16x32xbf16>
    %cst = arith.constant dense<0.000000e+00> : vector<8x32xf32>
    %3 = tpu.matmul %1, %2, %cst {dimension_numbers = #tpu.dot_dimension_numbers<[1], [0], [0], [1], [0, 0, 1, 1], [], []>} : vector<8x16xbf16>, vector<16x32xbf16>, vector<8x32xf32> -> vector<8x32xf32>
    %c0_3 = arith.constant 0 : index
    %c0_4 = arith.constant 0 : index
    %4 = vector.load %arg3[%c0_3, %c0_4] : memref<1x32xf32, #tpu.memory_space<vmem>>, vector<1x32xf32>
    %5 = vector.broadcast %4 : vector<1x32xf32> to vector<8x32xf32>
    %6 = arith.addf %3, %5 : vector<8x32xf32>
    %cst_5 = arith.constant 0.000000e+00 : f32
    %7 = vector.broadcast %cst_5 : f32 to vector<8x32xf32>
    %8 = arith.maximumf %6, %7 : vector<8x32xf32>
    %9 = arith.truncf %8 : vector<8x32xf32> to vector<8x32xbf16>
    %c0_6 = arith.constant 0 : index
    %c0_7 = arith.constant 0 : index
    %10 = vector.load %arg4[%c0_6, %c0_7] : memref<32x64xbf16, #tpu.memory_space<vmem>>, vector<32x64xbf16>
    %cst_8 = arith.constant dense<0.000000e+00> : vector<8x64xf32>
    %11 = tpu.matmul %9, %10, %cst_8 {dimension_numbers = #tpu.dot_dimension_numbers<[1], [0], [0], [1], [0, 0, 1, 1], [], []>} : vector<8x32xbf16>, vector<32x64xbf16>, vector<8x64xf32> -> vector<8x64xf32>
    %c0_9 = arith.constant 0 : index
    %c0_10 = arith.constant 0 : index
    %12 = vector.load %arg5[%c0_9, %c0_10] : memref<1x64xf32, #tpu.memory_space<vmem>>, vector<1x64xf32>
    %13 = vector.broadcast %12 : vector<1x64xf32> to vector<8x64xf32>
    %14 = arith.addf %11, %13 : vector<8x64xf32>
    %cst_11 = arith.constant 0.000000e+00 : f32
    %15 = vector.broadcast %cst_11 : f32 to vector<8x64xf32>
    %16 = arith.maximumf %14, %15 : vector<8x64xf32>
    %17 = arith.truncf %16 : vector<8x64xf32> to vector<8x64xbf16>
    %c0_12 = arith.constant 0 : index
    %c0_13 = arith.constant 0 : index
    %18 = vector.load %arg6[%c0_12, %c0_13] : memref<64x32xbf16, #tpu.memory_space<vmem>>, vector<64x32xbf16>
    %cst_14 = arith.constant dense<0.000000e+00> : vector<8x32xf32>
    %19 = tpu.matmul %17, %18, %cst_14 {dimension_numbers = #tpu.dot_dimension_numbers<[1], [0], [0], [1], [0, 0, 1, 1], [], []>} : vector<8x64xbf16>, vector<64x32xbf16>, vector<8x32xf32> -> vector<8x32xf32>
    %c0_15 = arith.constant 0 : index
    %c0_16 = arith.constant 0 : index
    %20 = vector.load %arg7[%c0_15, %c0_16] : memref<1x32xf32, #tpu.memory_space<vmem>>, vector<1x32xf32>
    %21 = vector.broadcast %20 : vector<1x32xf32> to vector<8x32xf32>
    %22 = arith.addf %19, %21 : vector<8x32xf32>
    %cst_17 = arith.constant 0.000000e+00 : f32
    %23 = vector.broadcast %cst_17 : f32 to vector<8x32xf32>
    %24 = arith.maximumf %22, %23 : vector<8x32xf32>
    %25 = arith.truncf %24 : vector<8x32xf32> to vector<8x32xbf16>
    %c0_18 = arith.constant 0 : index
    %c0_19 = arith.constant 0 : index
    %26 = vector.load %arg8[%c0_18, %c0_19] : memref<32x4xbf16, #tpu.memory_space<vmem>>, vector<32x4xbf16>
    %cst_20 = arith.constant dense<0.000000e+00> : vector<8x4xf32>
    %27 = tpu.matmul %25, %26, %cst_20 {dimension_numbers = #tpu.dot_dimension_numbers<[1], [0], [0], [1], [0, 0, 1, 1], [], []>} : vector<8x32xbf16>, vector<32x4xbf16>, vector<8x4xf32> -> vector<8x4xf32>
    %c0_21 = arith.constant 0 : index
    %c0_22 = arith.constant 0 : index
    %28 = vector.load %arg9[%c0_21, %c0_22] : memref<1x4xf32, #tpu.memory_space<vmem>>, vector<1x4xf32>
    %29 = vector.broadcast %28 : vector<1x4xf32> to vector<8x4xf32>
    %30 = arith.addf %27, %29 : vector<8x4xf32>
    %c0_23 = arith.constant 0 : index
    %c0_24 = arith.constant 0 : index
    %31 = vector.load %arg10[%c0_23, %c0_24] : memref<8x4xf32, #tpu.memory_space<vmem>>, vector<8x4xf32>
    tpu.vector_store %arg10[%c0_23, %c0_24], %30 {strides = array<i32>} : memref<8x4xf32, #tpu.memory_space<vmem>>, vector<8x4xf32>,
    return
  }
  func.func @transform_0(%arg0: i32) -> (i32, i32) {
    %c0_i32 = arith.constant 0 : i32
    %c0_i32_0 = arith.constant 0 : i32
    return %arg0, %c0_i32 : i32, i32
  }
  func.func @transform_1(%arg0: i32) -> (i32, i32) {
    %c0_i32 = arith.constant 0 : i32
    %c0_i32_0 = arith.constant 0 : i32
    %c0_i32_1 = arith.constant 0 : i32
    return %c0_i32, %c0_i32_0 : i32, i32
  }
  func.func @transform_2(%arg0: i32) -> (i32, i32) {
    %c0_i32 = arith.constant 0 : i32
    %c0_i32_0 = arith.constant 0 : i32
    %c0_i32_1 = arith.constant 0 : i32
    return %c0_i32, %c0_i32_0 : i32, i32
  }
  func.func @transform_3(%arg0: i32) -> (i32, i32) {
    %c0_i32 = arith.constant 0 : i32
    %c0_i32_0 = arith.constant 0 : i32
    %c0_i32_1 = arith.constant 0 : i32
    return %c0_i32, %c0_i32_0 : i32, i32
  }
  func.func @transform_4(%arg0: i32) -> (i32, i32) {
    %c0_i32 = arith.constant 0 : i32
    %c0_i32_0 = arith.constant 0 : i32
    %c0_i32_1 = arith.constant 0 : i32
    return %c0_i32, %c0_i32_0 : i32, i32
  }
  func.func @transform_5(%arg0: i32) -> (i32, i32) {
    %c0_i32 = arith.constant 0 : i32
    %c0_i32_0 = arith.constant 0 : i32
    %c0_i32_1 = arith.constant 0 : i32
    return %c0_i32, %c0_i32_0 : i32, i32
  }
  func.func @transform_6(%arg0: i32) -> (i32, i32) {
    %c0_i32 = arith.constant 0 : i32
    %c0_i32_0 = arith.constant 0 : i32
    %c0_i32_1 = arith.constant 0 : i32
    return %c0_i32, %c0_i32_0 : i32, i32
  }
  func.func @transform_7(%arg0: i32) -> (i32, i32) {
    %c0_i32 = arith.constant 0 : i32
    %c0_i32_0 = arith.constant 0 : i32
    %c0_i32_1 = arith.constant 0 : i32
    return %c0_i32, %c0_i32_0 : i32, i32
  }
  func.func @transform_8(%arg0: i32) -> (i32, i32) {
    %c0_i32 = arith.constant 0 : i32
    %c0_i32_0 = arith.constant 0 : i32
    %c0_i32_1 = arith.constant 0 : i32
    return %c0_i32, %c0_i32_0 : i32, i32
  }
  func.func @transform_9(%arg0: i32) -> (i32, i32) {
    %c0_i32 = arith.constant 0 : i32
    %c0_i32_0 = arith.constant 0 : i32
    return %arg0, %c0_i32 : i32, i32
  }
}

</mosaic_0001>

<bundles_post_ra>
// kernel: linear_qn_forward.1
= control target key start
LH: loop header
LB: loop body
LE: loop exit
PB: predicated region body
PF: predicated region fallthrough
CT: control target
= control target key end

     0   :  { %v397_v0 = vmov 0.0   ;;  %vm398_vm0 = vmmov 0   ;;  %vm50_vm1 = vcmask 130048   ;;  %vm119_vm2 = vcmask 261120   ;;  %s500_s1 = inlined_call_operand.vmem [shape: bf16[16,32], index: 1, kind: input, shape index: {}]   ;;  %s501_s0 = inlined_call_operand.vmem [shape: f32[8,16], index: 0, kind: input, shape index: {}]   ;;  %s502_s3 = inlined_call_operand.vmem [shape: bf16[32,64], index: 3, kind: input, shape index: {}]   ;;  %s503_s5 = inlined_call_operand.vmem [shape: bf16[64,32], index: 5, kind: input, shape index: {}]   ;;  %s504_s2 = inlined_call_operand.vmem [shape: f32[1,32], index: 2, kind: input, shape index: {}]   ;;  %s505_s7 = inlined_call_operand.vmem [shape: bf16[32,4], index: 7, kind: input, shape index: {}]   ;;  %s506_s4 = inlined_call_operand.vmem [shape: f32[1,64], index: 4, kind: input, shape index: {}]   ;;  %s507_s6 = inlined_call_operand.vmem [shape: f32[1,32], index: 6, kind: input, shape index: {}]   ;;  %s508_s8 = inlined_call_operand.vmem [shape: f32[1,4], index: 8, kind: input, shape index: {}]   ;;  %s509_s9 = inlined_call_operand.vmem [shape: f32[8,4], index: 9, kind: output, shape index: {}]  }
   0x1   :  { %352 = vmatprep.subr.bf16.mxu0 %v397_v0  ;;  %v388_v1 = vld [vmem:[%s500_s1] sm:$0xff]   ;;  %354 = vmatprep.mubr.msk.bf16.mxu0 %vm398_vm0, %v397_v0  ;;  %v389_v4 = vld [vmem:[%s502_s3 + $0x8] sm:$0xff]   ;;  %v391_v6 = vld [vmem:[%s503_s5 + $0x18] sm:$0xff]   ;;  %vm204_vm3 = vcmask 523264   ;;  %vm316_vm4 = vcmask 31744  }
   0x2   :  { %v33_v2 = vld [vmem:[%s501_s0] sm:$0xff]  ;;  %358 = vmatprep.subr.bf16.mxu1 %v397_v0  ;;  %362 = vmatprep.mubr.msk.bf16.mxu1 %vm398_vm0, %v397_v0  ;;  %v392_v7 = vld [vmem:[%s503_s5 + $0x10] sm:$0xff]   ;;  %v393_v16 = vld [vmem:[%s503_s5 + $0x8] sm:$0xff]  }
   0x3   :  { %353 = vmatpush3.bf16.msra.mxu0 %v388_v1  ;;  %v34_v3 = vpack.c.bf16 %v33_v2, %v33_v2  ;;  %359 = vmatpush3.bf16.msra.mxu1 %v389_v4  ;;  %v390_v5 = vld [vmem:[%s502_s3] sm:$0xff]   ;;  %v395_v18 = vld [vmem:[%s505_s7 + $0x8] sm:$0xff]  }
   0x4   :  { %366 = vmatprep.subr.bf16.mxu0 %v397_v0  ;;  %360 = vmatprep.subr.bf16.mxu1 %v397_v0  ;;  %v322_v8 = vld [vmem:[%s504_s2] ss:$0 sm:$0xff] }
   0x5   :  { %v394_v17 = vld [vmem:[%s503_s5] sm:$0xff]  }
   0x6   :  { %355 = vmatmul.mubr.msk.bf16.vlgmr.msra.gmra.mxu0 %vm50_vm1, %v34_v3  ;;  %v325_v19 = vld [vmem:[%s506_s4] ss:$0 sm:$0xff] }
   0x7   :  { %374 = vmatprep.mubr.msk.bf16.mxu0 %vm398_vm0, %v397_v0  ;;  %361 = vmatpush3.bf16.msra.mxu1 %v390_v5  ;;  %v396_v27 = vld [vmem:[%s505_s7] sm:$0xff]  }
   0x8   :  { %378 = vmatprep.subr.bf16.mxu1 %v397_v0  ;;  %367 = vmatpush3.bf16.msra.mxu0 %v391_v6  ;;  %v329_v28 = vld [vmem:[%s507_s6] ss:$0 sm:$0xff] }
   0x9   :  { %368 = vmatprep.subr.bf16.mxu0 %v397_v0  ;;  %v335_v36 = vld [vmem:[%s508_s8] ss:$0 sm:$0xff] }
   0xc   :  { %369 = vmatpush3.bf16.msra.mxu0 %v392_v7 }
   0xd   :  { %370 = vmatprep.subr.bf16.mxu0 %v397_v0 }
  0x10   :  { %371 = vmatpush3.bf16.msra.mxu0 %v393_v16 }
  0x11   :  { %372 = vmatprep.subr.bf16.mxu0 %v397_v0 }
  0x14   :  { %373 = vmatpush3.bf16.msra.mxu0 %v394_v17 }
  0xc6   :  { %v88_v9 = vpop.f32.mrf.mxu0 }
  0xc7   :  { %v89_v10 = vadd.f32 %v322_v8, %v88_v9 }
  0xc8   :  { %v356_v11 = vpop.f32.mrf.mxu0 }
  0xc9   :  { %v94_v12 = vmax.f32 %v89_v10, 0.0 }
  0xca   :  { %v91_v13 = vpop.f32.mrf.mxu0 }
  0xcb   :  { %v95_v14 = vpack.c.bf16 %v94_v12, %v94_v12 }
  0xcc   :  { %v357_v15 = vpop.f32.mrf.mxu0 }
  0xcd   :  { %363 = vmatmul.mubr.msk.bf16.vlgmr.msra.gmra.mxu1 %vm119_vm2, %v95_v14 }
  0xce   :  { %382 = vmatprep.mubr.msk.bf16.mxu1 %vm398_vm0, %v397_v0  ;;  %379 = vmatpush3.bf16.msra.mxu1 %v395_v18 }
  0xcf   :  { %380 = vmatprep.subr.bf16.mxu1 %v397_v0 }
  0xd2   :  { %381 = vmatpush3.bf16.msra.mxu1 %v396_v27 }
 0x18d   :  { %v157_v20 = vpop.f32.mrf.mxu1 }
 0x18e   :  { %v158_v21 = vadd.f32 %v325_v19, %v157_v20 }
 0x18f   :  { %v364_v22 = vpop.f32.mrf.mxu1 }
 0x190   :  { %v163_v23 = vmax.f32 %v158_v21, 0.0 }
 0x191   :  { %v160_v24 = vpop.f32.mrf.mxu1 }
 0x192   :  { %v164_v25 = vpack.c.bf16 %v163_v23, %v163_v23 }
 0x193   :  { %v365_v26 = vpop.f32.mrf.mxu1 }
 0x194   :  { %375 = vmatmul.mubr.msk.bf16.vlgmr.msra.gmra.mxu0 %vm204_vm3, %v164_v25 }
 0x254   :  { %v242_v29 = vpop.f32.mrf.mxu0 }
 0x255   :  { %v243_v30 = vadd.f32 %v329_v28, %v242_v29 }
 0x256   :  { %v376_v31 = vpop.f32.mrf.mxu0 }
 0x257   :  { %v248_v32 = vmax.f32 %v243_v30, 0.0 }
 0x258   :  { %v245_v33 = vpop.f32.mrf.mxu0 }
 0x259   :  { %v249_v34 = vpack.c.bf16 %v248_v32, %v248_v32 }
 0x25a   :  { %v377_v35 = vpop.f32.mrf.mxu0 }
 0x25b   :  { %383 = vmatmul.mubr.msk.bf16.vlgmr.msra.gmra.mxu1 %vm119_vm2, %v249_v34 }
 0x31b   :  { %v310_v37 = vpop.f32.mrf.mxu1 }
 0x31c   :  { %v311_v38 = vadd.f32 %v335_v36, %v310_v37 }
 0x31d   :  { %v384_v39 = vpop.f32.mrf.mxu1 }
 0x31e   :  { %317 = vst.msk [vmem:[%s509_s9] sm:$0xff] %vm316_vm4, %v311_v38 }
 0x31f   :  { %v313_v40 = vpop.f32.mrf.mxu1 }
 0x321   :  { %v385_v41 = vpop.f32.mrf.mxu1 }

</bundles_post_ra>
